<compile_context>
chip_gen: v6e
topology: v6e:2x2x1
jax: 0.10.0
libtpu: 0.0.40
codegen_flags: <defaults>
</compile_context>

<pallas_src>
import functools

import jax
import jax.numpy as jnp
from jax.experimental import pallas as pl
from jax.experimental.pallas import tpu as pltpu

EPS = 1e-5                   # BatchNorm2d default eps
LANE = 128                   # TPU lane width
ACT_DTYPE = jnp.bfloat16     # inter-stage activations + matmul inputs


# ------------------------------ small helpers ------------------------------ #

def _round_up(x, m):
    return (x + m - 1) // m * m


def _tpu_config():
    """Generation-aware knobs: v5e/v6e have 128 MiB VMEM per core, v7x 64 MiB."""
    phys = 128 * 1024 * 1024
    try:
        info = pltpu.get_tpu_info()
        v = getattr(info, "vmem_capacity_bytes", None)
        if v:
            phys = int(v)
    except Exception:
        pass
    if phys <= 64 * 1024 * 1024:          # v7x-class TensorCore
        return dict(bm_target=512,
                    vmem_limit=phys // 2,
                    vmem_budget=phys // 4)
    # v5e / v6e: plenty of physical VMEM -> bigger tiles, higher scoped limit.
    return dict(bm_target=1024,
                vmem_limit=min(phys // 2, 64 * 1024 * 1024),
                vmem_budget=40 * 1024 * 1024)


def _pick_bm(ms, row_bytes, fixed_bytes, cfg):
    """Row block: as close to bm_target as the VMEM budget allows, multiple of 8."""
    budget = max(cfg["vmem_budget"] - fixed_bytes, 1 << 20)
    bm = min(cfg["bm_target"], _round_up(ms, 8), max(8, budget // max(row_bytes, 1)))
    return max(8, (bm // 8) * 8)


def _pick_nb(n, ho, wo, hp, f1p, f2p, kk, cfg):
    """Images per grid step for the kxk kernel (fill the MXU, bound VMEM)."""
    budget = max(cfg["vmem_budget"] - 2 * 2 * kk * f1p * f2p, 1 << 20)
    best = 1
    for nb in range(1, n + 1):
        if n % nb:
            continue
        m2 = nb * ho * wo
        need = (2 * 2 * m2 * f1p          # y1 block, double-buffered bf16
                + 2 * 2 * m2 * f2p        # y2 block, double-buffered bf16
                + 4 * nb * hp * wo * f1p  # H-padded f32 scratch
                + 2 * m2 * kk * f1p       # im2col bf16 scratch
                + 4 * m2 * f2p)           # f32 matmul accumulator
        if need > budget:
            continue
        best = nb
        if m2 >= 512:                     # enough rows to amortize step overhead
            break
    return best


def _compiler_params(cfg):
    return pltpu.CompilerParams(dimension_semantics=("parallel",),
                                vmem_limit_bytes=cfg["vmem_limit"])


def _partial_stats(y):
    """Per-channel (sum, sum_sq) of an f32 (rows, C) tile, padded to 8 sublanes."""
    s = jnp.sum(y, axis=0, keepdims=True)
    q = jnp.sum(y * y, axis=0, keepdims=True)
    pad = jnp.zeros((6, y.shape[1]), jnp.float32)
    return jnp.concatenate([s, q, pad], axis=0)          # (8, C)


def _bn_fold(stats, count, gamma, beta):
    """Combine per-block partial stats -> (scale, shift) for y*scale + shift."""
    s = jnp.sum(stats[:, 0, :], axis=0)
    q = jnp.sum(stats[:, 1, :], axis=0)
    mean = s / count
    var = jnp.maximum(q / count - mean * mean, 0.0)      # biased variance (f32)
    scale = gamma * jax.lax.rsqrt(var + EPS)
    shift = beta - mean * scale
    return (scale.reshape(1, -1).astype(jnp.float32),
            shift.reshape(1, -1).astype(jnp.float32))


# ------------------------------ Pallas kernels ------------------------------ #

def _conv1_sc_kernel(x_ref, w_ref, y1_ref, ysc_ref, st1_ref, stsc_ref,
                     *, f1p, ms, bm, ragged):
    """Stage-1 1x1 conv + shortcut 1x1 conv as ONE matmul on the strided input."""
    x = x_ref[...]                                                     # (bm, Cin_p) bf16
    if ragged:                       # masked tail block of the cdiv grid
        i = pl.program_id(0)
        rows = jax.lax.broadcasted_iota(jnp.int32, x.shape, 0)
        x = jnp.where(rows < ms - i * bm, x, jnp.zeros_like(x))
    y = jnp.dot(x, w_ref[...], preferred_element_type=jnp.float32)     # (bm, F1p+F3p)
    y1 = y[:, :f1p]
    ysc = y[:, f1p:]
    y1_ref[...] = y1.astype(y1_ref.dtype)
    ysc_ref[...] = ysc.astype(ysc_ref.dtype)
    st1_ref[...] = _partial_stats(y1)[None]
    stsc_ref[...] = _partial_stats(ysc)[None]


def _conv_kxk_kernel(y1_ref, s_ref, t_ref, w2_ref, y2_ref, st_ref,
                     hpad_ref, col_ref, *, k, pad_lo, nb, ho, wo):
    """BN1 + ReLU + kxk 'same' conv as one K=k*k*F1p matmul, nb images per step."""
    f1p = y1_ref.shape[-1]
    f2p = w2_ref.shape[-1]
    m2 = nb * ho * wo

    # BN1 + ReLU in f32 (scale/shift broadcast along the channel lane dim).
    a = jnp.maximum(y1_ref[...].astype(jnp.float32) * s_ref[...] + t_ref[...], 0.0)

    # H-padded activation lives only in VMEM.  Only the (k-1) halo rows are
    # re-zeroed each step (cheap + megacore-safe); interior rows are rewritten.
    pad_hi = k - 1 - pad_lo
    if pad_lo > 0:
        hpad_ref[:, :pad_lo, :, :] = jnp.zeros((nb, pad_lo, wo, f1p), jnp.float32)
    if pad_hi > 0:
        hpad_ref[:, pad_lo + ho:, :, :] = jnp.zeros((nb, pad_hi, wo, f1p), jnp.float32)
    hpad_ref[:, pad_lo:pad_lo + ho, :, :] = a

    # im2col: H taps are cheap H-slices of the padded scratch; W taps are XLU
    # sublane rotations + a border mask (no sublane-unaligned slicing, no HBM
    # patches array).  Slabs land at lane-aligned column offsets.
    w_idx = jax.lax.broadcasted_iota(jnp.int32, (1, wo, f1p), 1)
    for kh in range(k):
        rows = hpad_ref[:, kh:kh + ho, :, :].reshape(nb * ho, wo, f1p)
        for kw in range(k):
            dw = kw - pad_lo
            if dw == 0:
                tap = rows
            else:
                tap = pltpu.roll(rows, (-dw) % wo, 1)
                tap = jnp.where((w_idx >= -dw) & (w_idx <= wo - 1 - dw),
                                tap, jnp.zeros_like(tap))
            c0 = (kh * k + kw) * f1p
            col_ref[:, :, c0:c0 + f1p] = tap.astype(col_ref.dtype)

    # One full-depth MXU matmul (instead of k*k half-depth matmuls + VALU adds).
    acc = jnp.dot(col_ref[...].reshape(m2, k * k * f1p), w2_ref[...],
                  preferred_element_type=jnp.float32)                  # (m2, F2p) f32
    y2_ref[...] = acc.reshape(nb, ho, wo, f2p).astype(y2_ref.dtype)
    st_ref[...] = _partial_stats(acc)[None]


def _bn_relu_matmul_kernel(y_ref, s_ref, t_ref, w_ref, o_ref, st_ref,
                           *, ms, bm, ragged):
    """BN2 + ReLU fused with the stage-3 1x1 conv, plus stats for BN3."""
    a = jnp.maximum(y_ref[...].astype(jnp.float32) * s_ref[...] + t_ref[...], 0.0)
    if ragged:                       # zero tail rows AFTER BN so stats stay clean
        i = pl.program_id(0)
        rows = jax.lax.broadcasted_iota(jnp.int32, a.shape, 0)
        a = jnp.where(rows < ms - i * bm, a, jnp.zeros_like(a))
    y = jnp.dot(a.astype(w_ref.dtype), w_ref[...], preferred_element_type=jnp.float32)
    o_ref[...] = y.astype(o_ref.dtype)
    st_ref[...] = _partial_stats(y)[None]


def _dual_bn_add_relu_kernel(y3_ref, ysc_ref, s3_ref, t3_ref, ss_ref, ts_ref, o_ref):
    """BN3(main) + BN(shortcut) + residual add + ReLU, one bf16 output write."""
    o = (y3_ref[...].astype(jnp.float32) * s3_ref[...] + t3_ref[...]
         + ysc_ref[...].astype(jnp.float32) * ss_ref[...] + ts_ref[...])
    o_ref[...] = jnp.maximum(o, 0.0).astype(o_ref.dtype)


# ------------------------------ pallas_call wrappers ------------------------ #

def conv1x1_pair(x2d, w1s, f1p, cfg):
    ms, cin_p = x2d.shape
    fout = w1s.shape[1]
    f3p = fout - f1p
    row_bytes = 2 * 2 * cin_p + 2 * 2 * fout + 4 * fout
    fixed = 2 * 2 * cin_p * fout
    bm = _pick_bm(ms, row_bytes, fixed, cfg)
    g = pl.cdiv(ms, bm)
    kern = functools.partial(_conv1_sc_kernel, f1p=f1p, ms=ms, bm=bm,
                             ragged=(ms % bm != 0))
    return pl.pallas_call(
        kern,
        out_shape=(jax.ShapeDtypeStruct((ms, f1p), ACT_DTYPE),
                   jax.ShapeDtypeStruct((ms, f3p), ACT_DTYPE),
                   jax.ShapeDtypeStruct((g, 8, f1p), jnp.float32),
                   jax.ShapeDtypeStruct((g, 8, f3p), jnp.float32)),
        grid=(g,),
        in_specs=[pl.BlockSpec((bm, cin_p), lambda i: (i, 0)),
                  pl.BlockSpec((cin_p, fout), lambda i: (0, 0))],
        out_specs=(pl.BlockSpec((bm, f1p), lambda i: (i, 0)),
                   pl.BlockSpec((bm, f3p), lambda i: (i, 0)),
                   pl.BlockSpec((1, 8, f1p), lambda i: (i, 0, 0)),
                   pl.BlockSpec((1, 8, f3p), lambda i: (i, 0, 0))),
        compiler_params=_compiler_params(cfg),
    )(x2d, w1s)


def conv_kxk(y1_4d, scale1, shift1, w2_2d, k, cfg):
    n, ho, wo, f1p = y1_4d.shape
    kk = k * k
    f2p = w2_2d.shape[-1]
    pad_lo = (k - 1) // 2
    hp = ho + k - 1
    nb = _pick_nb(n, ho, wo, hp, f1p, f2p, kk, cfg)
    g = n // nb
    kern = functools.partial(_conv_kxk_kernel, k=k, pad_lo=pad_lo,
                             nb=nb, ho=ho, wo=wo)
    # TODO(synk): for very large feature maps (e.g. 56x56) add H-tiling with a
    # halo inside each image so the im2col scratch and f32 accumulator shrink.
    return pl.pallas_call(
        kern,
        out_shape=(jax.ShapeDtypeStruct((n, ho, wo, f2p), ACT_DTYPE),
                   jax.ShapeDtypeStruct((g, 8, f2p), jnp.float32)),
        grid=(g,),
        in_specs=[pl.BlockSpec((nb, ho, wo, f1p), lambda i: (i, 0, 0, 0)),
                  pl.BlockSpec((1, f1p), lambda i: (0, 0)),
                  pl.BlockSpec((1, f1p), lambda i: (0, 0)),
                  pl.BlockSpec((kk * f1p, f2p), lambda i: (0, 0))],
        out_specs=(pl.BlockSpec((nb, ho, wo, f2p), lambda i: (i, 0, 0, 0)),
                   pl.BlockSpec((1, 8, f2p), lambda i: (i, 0, 0))),
        scratch_shapes=[pltpu.VMEM((nb, hp, wo, f1p), jnp.float32),
                        pltpu.VMEM((nb * ho, wo, kk * f1p), ACT_DTYPE)],
        compiler_params=_compiler_params(cfg),
    )(y1_4d, scale1, shift1, w2_2d)


def bn_relu_conv1x1(y2d, scale, shift, w, cfg):
    ms, f2p = y2d.shape
    f3p = w.shape[1]
    row_bytes = 2 * 2 * f2p + 2 * 2 * f3p + 4 * f2p + 4 * f3p
    fixed = 2 * 2 * f2p * f3p
    bm = _pick_bm(ms, row_bytes, fixed, cfg)
    g = pl.cdiv(ms, bm)
    kern = functools.partial(_bn_relu_matmul_kernel, ms=ms, bm=bm,
                             ragged=(ms % bm != 0))
    return pl.pallas_call(
        kern,
        out_shape=(jax.ShapeDtypeStruct((ms, f3p), ACT_DTYPE),
                   jax.ShapeDtypeStruct((g, 8, f3p), jnp.float32)),
        grid=(g,),
        in_specs=[pl.BlockSpec((bm, f2p), lambda i: (i, 0)),
                  pl.BlockSpec((1, f2p), lambda i: (0, 0)),
                  pl.BlockSpec((1, f2p), lambda i: (0, 0)),
                  pl.BlockSpec((f2p, f3p), lambda i: (0, 0))],
        out_specs=(pl.BlockSpec((bm, f3p), lambda i: (i, 0)),
                   pl.BlockSpec((1, 8, f3p), lambda i: (i, 0, 0))),
        compiler_params=_compiler_params(cfg),
    )(y2d, scale, shift, w)


def dual_bn_add_relu(y3, ysc, s3, t3, ssc, tsc, cfg):
    ms, f3p = y3.shape
    row_bytes = 2 * 2 * 2 * f3p + 2 * 2 * f3p + 4 * f3p
    bm = _pick_bm(ms, row_bytes, 0, cfg)
    g = pl.cdiv(ms, bm)
    return pl.pallas_call(
        _dual_bn_add_relu_kernel,
        out_shape=jax.ShapeDtypeStruct((ms, f3p), ACT_DTYPE),
        grid=(g,),
        in_specs=[pl.BlockSpec((bm, f3p), lambda i: (i, 0)),
                  pl.BlockSpec((bm, f3p), lambda i: (i, 0)),
                  pl.BlockSpec((1, f3p), lambda i: (0, 0)),
                  pl.BlockSpec((1, f3p), lambda i: (0, 0)),
                  pl.BlockSpec((1, f3p), lambda i: (0, 0)),
                  pl.BlockSpec((1, f3p), lambda i: (0, 0))],
        out_specs=pl.BlockSpec((bm, f3p), lambda i: (i, 0)),
        compiler_params=_compiler_params(cfg),
    )(y3, ysc, s3, t3, ssc, tsc)


# ------------------------------- params / glue ------------------------------ #

def _xavier_uniform(key, cout, cin, kh, kw):
    fan_in = cin * kh * kw
    fan_out = cout * kh * kw
    a = (6.0 / (fan_in + fan_out)) ** 0.5
    return jax.random.uniform(key, (cout, cin, kh, kw), jnp.float32, -a, a)


def init_params(key, in_channels, filters, kernel_size):
    """Xavier conv weights (bias=0 in the reference -> dropped), BN gamma=1 /
    beta=0, stored in padded lane-dense matmul layout, bf16."""
    F1, F2, F3 = filters
    k = kernel_size
    k1, k2, k3, k4 = jax.random.split(key, 4)
    w1 = _xavier_uniform(k1, F1, in_channels, 1, 1)
    w2 = _xavier_uniform(k2, F2, F1, k, k)
    w3 = _xavier_uniform(k3, F3, F2, 1, 1)
    ws = _xavier_uniform(k4, F3, in_channels, 1, 1)

    cin_p = _round_up(in_channels, LANE)
    f1p, f2p, f3p = (_round_up(c, LANE) for c in (F1, F2, F3))

    def mat1x1(w, rp, cp):          # (Cout,Cin,1,1) -> (Cin_p, Cout_p)
        m = jnp.transpose(w[:, :, 0, 0], (1, 0))
        return jnp.pad(m, ((0, rp - m.shape[0]), (0, cp - m.shape[1]))).astype(ACT_DTYPE)

    def matkxk(w, rp, cp):          # (Cout,Cin,k,k) -> (k*k*Cin_p, Cout_p)
        m = jnp.transpose(w, (2, 3, 1, 0)).reshape(k * k, w.shape[1], w.shape[0])
        m = jnp.pad(m, ((0, 0), (0, rp - m.shape[1]), (0, cp - m.shape[2])))
        return m.reshape(k * k * rp, cp).astype(ACT_DTYPE)

    def gamma(c, cp):   # padded lanes get gamma=0 so padded channels stay exactly 0
        return jnp.pad(jnp.ones((c,), jnp.float32), (0, cp - c))

    def beta(c, cp):
        return jnp.zeros((cp,), jnp.float32)

    return dict(
        # stage-1 conv and shortcut conv fused into one MXU weight
        w1s=jnp.concatenate([mat1x1(w1, cin_p, f1p), mat1x1(ws, cin_p, f3p)], axis=1),
        w2=matkxk(w2, f1p, f2p),
        w3=mat1x1(w3, f2p, f3p),
        g1=gamma(F1, f1p), be1=beta(F1, f1p),
        g2=gamma(F2, f2p), be2=beta(F2, f2p),
        g3=gamma(F3, f3p), be3=beta(F3, f3p),
        gs=gamma(F3, f3p), bes=beta(F3, f3p),
        f1p=f1p,
        raw=dict(w1=w1, w2=w2, w3=w3, ws=ws),    # f32 weights for the reference
    )


def convolutional_block(x_nchw, params, filters, kernel_size, stride):
    """ConvolutionalBlock.forward: relu(main_path(x) + shortcut_path(x)); NCHW in/out."""
    k = kernel_size
    F3 = filters[2]
    n, cin, h, w = x_nchw.shape
    ho = (h - 1) // stride + 1
    wo = (w - 1) // stride + 1
    ms = n * ho * wo
    cfg = _tpu_config()

    cin_p = params['w1s'].shape[0]
    f1p = params['f1p']
    f2p = params['w3'].shape[0]

    # NCHW->NHWC, stride subsample, lane pad, bf16 cast: one fused XLA pass over x.
    xs = jnp.transpose(x_nchw, (0, 2, 3, 1))[:, ::stride, ::stride, :]
    xs = jnp.pad(xs, ((0, 0), (0, 0), (0, 0), (0, cin_p - cin))).astype(ACT_DTYPE)
    xs2 = xs.reshape(ms, cin_p)

    # Kernel 1: stage-1 1x1 conv + shortcut 1x1 conv as one matmul (+ BN stats).
    y1, ysc, st1, stsc = conv1x1_pair(xs2, params['w1s'], f1p, cfg)
    s1, t1 = _bn_fold(st1, ms, params['g1'], params['be1'])
    ssc, tsc = _bn_fold(stsc, ms, params['gs'], params['bes'])

    # Kernel 2: BN1+ReLU + kxk 'same' conv (single K=k*k*F1p matmul), nb imgs/step.
    y2, st2 = conv_kxk(y1.reshape(n, ho, wo, f1p), s1, t1, params['w2'], k, cfg)
    s2, t2 = _bn_fold(st2, ms, params['g2'], params['be2'])

    # Kernel 3: BN2+ReLU + 1x1 conv (+ BN3 stats).
    y3, st3 = bn_relu_conv1x1(y2.reshape(ms, f2p), s2, t2, params['w3'], cfg)
    s3, t3 = _bn_fold(st3, ms, params['g3'], params['be3'])

    # Kernel 4: BN3 + shortcut BN + residual add + ReLU, one bf16 output write.
    out = dual_bn_add_relu(y3, ysc, s3, t3, ssc, tsc, cfg)            # (Ms, F3p) bf16

    out = out[:, :F3].astype(jnp.float32).reshape(n, ho, wo, F3)
    return jnp.transpose(out, (0, 3, 1, 2))                           # back to NCHW
    # TODO(synk): BatchNorm running_mean/running_var/momentum bookkeeping is not
    # reproduced; it does not affect the training-mode forward output.


def reference_block(x, raw, kernel_size, stride):
    """Pure-JAX/XLA replica of ConvolutionalBlock.forward (train-mode BN, f32)."""
    def conv(x, w, s, padding):
        return jax.lax.conv_general_dilated(
            x, w, window_strides=(s, s), padding=padding,
            dimension_numbers=('NCHW', 'OIHW', 'NCHW'))

    def bn(y):
        mean = jnp.mean(y, axis=(0, 2, 3), keepdims=True)
        var = jnp.mean((y - mean) ** 2, axis=(0, 2, 3), keepdims=True)
        return (y - mean) * jax.lax.rsqrt(var + EPS)     # gamma=1, beta=0, bias=0

    k = kernel_size
    pad = (k - 1) // 2
    y = jax.nn.relu(bn(conv(x, raw['w1'], stride, 'VALID')))
    y = jax.nn.relu(bn(conv(y, raw['w2'], 1, [(pad, k - 1 - pad), (pad, k - 1 - pad)])))
    y = bn(conv(y, raw['w3'], 1, 'VALID'))
    sc = bn(conv(x, raw['ws'], stride, 'VALID'))
    return jax.nn.relu(y + sc)


if __name__ == "__main__":
    key = jax.random.PRNGKey(0)
    k_x, k_p = jax.random.split(key)

    batch, in_channels, spatial = 2, 4, 16
    filters = (4, 4, 8)
    kernel_size = 3
    stride = 2

    x = jax.random.normal(k_x, (batch, in_channels, spatial, spatial), jnp.float32)
    params = init_params(k_p, in_channels, filters, kernel_size)

    y = convolutional_block(x, params, filters, kernel_size, stride)
    y = jax.block_until_ready(y)
    assert y.shape == (batch, filters[2], spatial // stride, spatial // stride)
    assert bool(jnp.all(y >= 0.0))   # ReLU output

    # Validate against a pure-JAX reference (bf16 matmul inputs -> loose tolerance).
    y_ref = reference_block(x, params['raw'], kernel_size, stride)
    err = float(jnp.max(jnp.abs(y - y_ref)))
    assert err < 0.2, f"max abs err vs reference: {err}"
    print("KERNEL_OK")
</pallas_src>

<mosaic_0001>
module attributes {stable_mosaic.version = 11 : i64} {
  func.func @_conv1_sc_kernel(%arg0: i32, %arg1: memref<128x128xbf16, #tpu.memory_space<vmem>>, %arg2: memref<128x256xbf16, #tpu.memory_space<vmem>>, %arg3: memref<128x128xbf16, #tpu.memory_space<vmem>>, %arg4: memref<128x128xbf16, #tpu.memory_space<vmem>>, %arg5: memref<1x8x128xf32, #tpu.memory_space<vmem>>, %arg6: memref<1x8x128xf32, #tpu.memory_space<vmem>>) attributes {dimension_semantics = [#tpu.dimension_semantics<parallel>], iteration_bounds = array<i64: 1>, scalar_prefetch = 0 : i64, scratch_operands = 0 : i64, tpu.core_type = #tpu.core_type<tc>, window_params = [{transform_indices = @transform_0, window_bounds = array<i64: 128, 128>}, {pipeline_mode = #tpu.pipeline_mode<synchronous>, transform_indices = @transform_1, window_bounds = array<i64: 128, 256>}, {transform_indices = @transform_2, window_bounds = array<i64: 128, 128>}, {transform_indices = @transform_3, window_bounds = array<i64: 128, 128>}, {transform_indices = @transform_4, window_bounds = array<i64: 1, 8, 128>}, {transform_indices = @transform_5, window_bounds = array<i64: 1, 8, 128>}]} {
    %c0 = arith.constant 0 : index
    %c0_0 = arith.constant 0 : index
    %0 = vector.load %arg1[%c0, %c0_0] : memref<128x128xbf16, #tpu.memory_space<vmem>>, vector<128x128xbf16>
    %c0_1 = arith.constant 0 : index
    %c0_2 = arith.constant 0 : index
    %1 = vector.load %arg2[%c0_1, %c0_2] : memref<128x256xbf16, #tpu.memory_space<vmem>>, vector<128x256xbf16>
    %cst = arith.constant dense<0.000000e+00> : vector<128x256xf32>
    %2 = tpu.matmul %0, %1, %cst {dimension_numbers = #tpu.dot_dimension_numbers<[1], [0], [0], [1], [0, 0, 1, 1], [], []>} : vector<128x128xbf16>, vector<128x256xbf16>, vector<128x256xf32> -> vector<128x256xf32>
    %3 = vector.extract_strided_slice %2 {offsets = [0, 0], sizes = [128, 128], strides = [1, 1]} : vector<128x256xf32> to vector<128x128xf32>
    %4 = vector.extract_strided_slice %2 {offsets = [0, 128], sizes = [128, 128], strides = [1, 1]} : vector<128x256xf32> to vector<128x128xf32>
    %5 = arith.truncf %3 : vector<128x128xf32> to vector<128x128xbf16>
    %c0_3 = arith.constant 0 : index
    %c0_4 = arith.constant 0 : index
    %6 = vector.load %arg3[%c0_3, %c0_4] : memref<128x128xbf16, #tpu.memory_space<vmem>>, vector<128x128xbf16>
    tpu.vector_store %arg3[%c0_3, %c0_4], %5 {strides = array<i32>} : memref<128x128xbf16, #tpu.memory_space<vmem>>, vector<128x128xbf16>,
    %7 = arith.truncf %4 : vector<128x128xf32> to vector<128x128xbf16>
    %c0_5 = arith.constant 0 : index
    %c0_6 = arith.constant 0 : index
    %8 = vector.load %arg4[%c0_5, %c0_6] : memref<128x128xbf16, #tpu.memory_space<vmem>>, vector<128x128xbf16>
    tpu.vector_store %arg4[%c0_5, %c0_6], %7 {strides = array<i32>} : memref<128x128xbf16, #tpu.memory_space<vmem>>, vector<128x128xbf16>,
    %cst_7 = arith.constant dense<0.000000e+00> : vector<128xf32>
    %9 = vector.multi_reduction <add>, %3, %cst_7 [0] : vector<128x128xf32> to vector<128xf32>
    %10 = vector.shape_cast %9 : vector<128xf32> to vector<1x128xf32>
    %11 = arith.mulf %3, %3 : vector<128x128xf32>
    %cst_8 = arith.constant dense<0.000000e+00> : vector<128xf32>
    %12 = vector.multi_reduction <add>, %11, %cst_8 [0] : vector<128x128xf32> to vector<128xf32>
    %13 = vector.shape_cast %12 : vector<128xf32> to vector<1x128xf32>
    %cst_9 = arith.constant 0.000000e+00 : f32
    %14 = vector.broadcast %cst_9 : f32 to vector<6x128xf32>
    %15 = tpu.concatenate %10, %13, %14 in 0 : vector<1x128xf32>, vector<1x128xf32>, vector<6x128xf32> -> vector<8x128xf32>
    %16 = vector.shape_cast %15 : vector<8x128xf32> to vector<1x8x128xf32>
    %c0_10 = arith.constant 0 : index
    %c0_11 = arith.constant 0 : index
    %c0_12 = arith.constant 0 : index
    %17 = vector.load %arg5[%c0_10, %c0_11, %c0_12] : memref<1x8x128xf32, #tpu.memory_space<vmem>>, vector<1x8x128xf32>
    tpu.vector_store %arg5[%c0_10, %c0_11, %c0_12], %16 {strides = array<i32>} : memref<1x8x128xf32, #tpu.memory_space<vmem>>, vector<1x8x128xf32>,
    %cst_13 = arith.constant dense<0.000000e+00> : vector<128xf32>
    %18 = vector.multi_reduction <add>, %4, %cst_13 [0] : vector<128x128xf32> to vector<128xf32>
    %19 = vector.shape_cast %18 : vector<128xf32> to vector<1x128xf32>
    %20 = arith.mulf %4, %4 : vector<128x128xf32>
    %cst_14 = arith.constant dense<0.000000e+00> : vector<128xf32>
    %21 = vector.multi_reduction <add>, %20, %cst_14 [0] : vector<128x128xf32> to vector<128xf32>
    %22 = vector.shape_cast %21 : vector<128xf32> to vector<1x128xf32>
    %cst_15 = arith.constant 0.000000e+00 : f32
    %23 = vector.broadcast %cst_15 : f32 to vector<6x128xf32>
    %24 = tpu.concatenate %19, %22, %23 in 0 : vector<1x128xf32>, vector<1x128xf32>, vector<6x128xf32> -> vector<8x128xf32>
    %25 = vector.shape_cast %24 : vector<8x128xf32> to vector<1x8x128xf32>
    %c0_16 = arith.constant 0 : index
    %c0_17 = arith.constant 0 : index
    %c0_18 = arith.constant 0 : index
    %26 = vector.load %arg6[%c0_16, %c0_17, %c0_18] : memref<1x8x128xf32, #tpu.memory_space<vmem>>, vector<1x8x128xf32>
    tpu.vector_store %arg6[%c0_16, %c0_17, %c0_18], %25 {strides = array<i32>} : memref<1x8x128xf32, #tpu.memory_space<vmem>>, vector<1x8x128xf32>,
    return
  }
  func.func @transform_0(%arg0: i32) -> (i32, i32) {
    %c0_i32 = arith.constant 0 : i32
    %c0_i32_0 = arith.constant 0 : i32
    return %arg0, %c0_i32 : i32, i32
  }
  func.func @transform_1(%arg0: i32) -> (i32, i32) {
    %c0_i32 = arith.constant 0 : i32
    %c0_i32_0 = arith.constant 0 : i32
    %c0_i32_1 = arith.constant 0 : i32
    return %c0_i32, %c0_i32_0 : i32, i32
  }
  func.func @transform_2(%arg0: i32) -> (i32, i32) {
    %c0_i32 = arith.constant 0 : i32
    %c0_i32_0 = arith.constant 0 : i32
    return %arg0, %c0_i32 : i32, i32
  }
  func.func @transform_3(%arg0: i32) -> (i32, i32) {
    %c0_i32 = arith.constant 0 : i32
    %c0_i32_0 = arith.constant 0 : i32
    return %arg0, %c0_i32 : i32, i32
  }
  func.func @transform_4(%arg0: i32) -> (i32, i32, i32) {
    %c0_i32 = arith.constant 0 : i32
    %c0_i32_0 = arith.constant 0 : i32
    %c0_i32_1 = arith.constant 0 : i32
    return %arg0, %c0_i32, %c0_i32_0 : i32, i32, i32
  }
  func.func @transform_5(%arg0: i32) -> (i32, i32, i32) {
    %c0_i32 = arith.constant 0 : i32
    %c0_i32_0 = arith.constant 0 : i32
    %c0_i32_1 = arith.constant 0 : i32
    return %arg0, %c0_i32, %c0_i32_0 : i32, i32, i32
  }
}

</mosaic_0001>

<bundles_post_ra>
// kernel: tpu_custom_call.1
= control target key start
LH: loop header
LB: loop body
LE: loop exit
PB: predicated region body
PF: predicated region fallthrough
CT: control target
= control target key end

     0   :  { %11 = vsyncpa [#allocation3], 0  ;;  %s1219_s0 = inlined_call_operand.hbm [shape: bf16[128,128], index: 0, kind: input, shape index: {}]   ;;  %s1220_s1 = inlined_call_operand.hbm [shape: bf16[128,256], index: 1, kind: input, shape index: {}]   ;;  %s1221_s2 = inlined_call_operand.hbm [shape: bf16[128,128], index: 2, kind: output, shape index: {0}]   ;;  %s1222_s3 = inlined_call_operand.hbm [shape: bf16[128,128], index: 3, kind: output, shape index: {1}]   ;;  %s1223_s4 = inlined_call_operand.hbm [shape: f32[1,8,128], index: 4, kind: output, shape index: {2}]   ;;  %s1224_s5 = inlined_call_operand.hbm [shape: f32[1,8,128], index: 5, kind: output, shape index: {3}]  }
   0x1   :  { %12 = vsyncpa [#allocation6], 0 }
   0x2   :  { %13 = vsyncpa [#allocation4], 0 }
   0x3   :  { %14 = vsyncpa [#allocation9], 0 }
   0x4   :  { %15 = vsyncpa [#allocation12], 0  ;;  %s1036_s18 = smov [#allocation2]  }
   0x5   :  { %s21_s19 = sshll.u32 %s1036_s18, 4  ;;  %s22_s19 = int_to_ptr.vmem [resolvable:$true] %s21_s19 }
   0x6   :  { %s914_s20 = scalar_lea.vmem %s22_s19, 1024  ;;  %p919_p1 = scmp.lt.s32.totalorder %s22_s19, %s22_s19 }
   0x7   :  { %p915_p0 = scmp.ne.s32.totalorder %s22_s19, %s914_s20  ;;  %p920_p2 = scmp.lt.s32.totalorder %s914_s20, %s914_s20 }
   0x9   :  { %p921_p3 = por %p920_p2, %p919_p1 }
   0xb   :  { %p922_p4 = pnand %p921_p3, %p915_p0 }
   0xd   :  { %925 = shalt.err (!%p922_p4)
}
   0xe   :  { %s1037_s21 = smov 64   ;;  %s1038_s22 = smov 4  }
   0xf   :  { %27 = dma.hbm_to_vmem [thread:$0]  %s1219_s0, 1024, %s22_s19, [#allocation3], %s1037_s21, %s1037_s21, %s1038_s22  }
  0x10   :  { %s1039_s25 = smov [#allocation5]  }
  0x11   :  { %s33_s26 = sshll.u32 %s1039_s25, 4  ;;  %s34_s26 = int_to_ptr.vmem [resolvable:$true] %s33_s26 }
  0x12   :  { %s934_s27 = scalar_lea.vmem %s34_s26, 2048  ;;  %p939_p6 = scmp.lt.s32.totalorder %s34_s26, %s34_s26 }
  0x13   :  { %p935_p5 = scmp.ne.s32.totalorder %s34_s26, %s934_s27  ;;  %p940_p7 = scmp.lt.s32.totalorder %s934_s27, %s934_s27 }
  0x15   :  { %p941_p8 = por %p940_p7, %p939_p6 }
  0x17   :  { %p942_p9 = pnand %p941_p8, %p935_p5 }
  0x19   :  { %945 = shalt.err (!%p942_p9)
}
  0x1a   :  { %s1040_s28 = smov 128   ;;  %s1041_s29 = smov 8  }
  0x1b   :  { %39 = dma.hbm_to_vmem [thread:$0]  %s1220_s1, 2048, %s34_s26, [#allocation6], %s1040_s28, %s1040_s28, %s1041_s29  }
  0x1c   :  { %1026 = dma.done.wait [#allocation3], 1024  }
  0x1d   :  { %1027 = vsyncadd [#allocation3], 4294966272 }
  0x1e   :  { %1028 = dma.done.wait [#allocation6], 2048  }
  0x1f   :  { %1029 = vsyncadd [#allocation6], 4294965248  ;;  %v1042_v0 = vmov 0   ;;  %v874_v1 = vld [vmem:[#allocation5 + $0x74] ss:$8 sps:$4 sm:$0xff]   ;;  %v898_v17 = vld [vmem:[#allocation2] sm:$0xff]  }
  0x20   :  { %239 = vmatprep.mubr.bf16.mxu0 %v1042_v0  ;;  %279 = vmatprep.mubr.bf16.mxu1 %v1042_v0  ;;  %v876_v2 = vld [vmem:[#allocation5 + $0x70] ss:$8 sps:$4 sm:$0xff]   ;;  %v877_v3 = vld [vmem:[#allocation5 + $0x64] ss:$8 sps:$4 sm:$0xff]   ;;  %v879_v4 = vld [vmem:[#allocation5 + $0x60] ss:$8 sps:$4 sm:$0xff]  }
  0x21   :  { %207 = vmatprep.subr.bf16.mxu0 %v874_v1  ;;  %847 = vmatprep.subr.bf16.mxu1 %v874_v1  ;;  %v880_v5 = vld [vmem:[#allocation5 + $0x54] ss:$8 sps:$4 sm:$0xff]   ;;  %v882_v6 = vld [vmem:[#allocation5 + $0x50] ss:$8 sps:$4 sm:$0xff]   ;;  %v883_v7 = vld [vmem:[#allocation5 + $0x44] ss:$8 sps:$4 sm:$0xff]  }
  0x22   :  { %208 = vmatpush1.bf16.msra.mxu0 %v876_v2  ;;  %855 = vmatpush1.bf16.msra.mxu1 %v876_v2  ;;  %v885_v8 = vld [vmem:[#allocation5 + $0x40] ss:$8 sps:$4 sm:$0xff]   ;;  %v886_v9 = vld [vmem:[#allocation5 + $0x34] ss:$8 sps:$4 sm:$0xff]   ;;  %v888_v10 = vld [vmem:[#allocation5 + $0x30] ss:$8 sps:$4 sm:$0xff]  }
  0x23   :  { %209 = vmatprep.subr.bf16.mxu0 %v877_v3  ;;  %848 = vmatprep.subr.bf16.mxu1 %v877_v3  ;;  %v889_v11 = vld [vmem:[#allocation5 + $0x24] ss:$8 sps:$4 sm:$0xff]   ;;  %v891_v12 = vld [vmem:[#allocation5 + $0x20] ss:$8 sps:$4 sm:$0xff]   ;;  %v892_v13 = vld [vmem:[#allocation5 + $0x14] ss:$8 sps:$4 sm:$0xff]  }
  0x24   :  { %v894_v14 = vld [vmem:[#allocation5 + $0x10] ss:$8 sps:$4 sm:$0xff]   ;;  %v895_v15 = vld [vmem:[#allocation5 + $0x4] ss:$8 sps:$4 sm:$0xff]   ;;  %v897_v16 = vld [vmem:[#allocation5] ss:$8 sps:$4 sm:$0xff]  }
  0x25   :  { %v900_v18 = vld [vmem:[#allocation2 + $0x20] sm:$0xff]   ;;  %v899_v19 = vld [vmem:[#allocation2 + $0x8] sm:$0xff]   ;;  %v901_v21 = vld [vmem:[#allocation2 + $0x10] sm:$0xff]   ;;  %s1043_s0 = smov [#allocation7]   ;;  %s1044_s7 = smov [#allocation8]  }
  0x26   :  { %210 = vmatpush1.bf16.msra.mxu0 %v879_v4  ;;  %856 = vmatpush1.bf16.msra.mxu1 %v879_v4  ;;  %v902_v20 = vld [vmem:[#allocation2 + $0x28] sm:$0xff]   ;;  %v904_v22 = vld [vmem:[#allocation2 + $0x30] sm:$0xff]   ;;  %v903_v23 = vld [vmem:[#allocation2 + $0x18] sm:$0xff]   ;;  %s609_s1 = sshll.u32 %s1043_s0, 4  ;;  %s621_s8 = sshll.u32 %s1044_s7, 4  ;;  %s610_s1 = int_to_ptr.vmem [resolvable:$true] %s609_s1  ;;  %s1145_s8 = int_to_ptr.vmem [resolvable:$true] %s621_s8 }
  0x27   :  { %211 = vmatprep.subr.bf16.mxu0 %v880_v5  ;;  %849 = vmatprep.subr.bf16.mxu1 %v880_v5  ;;  %v905_v24 = vld [vmem:[#allocation2 + $0x38] sm:$0xff]   ;;  %s946_s9 = scalar_lea.vmem %s610_s1, 1024  ;;  %p951_p11 = scmp.lt.s32.totalorder %s610_s1, %s610_s1 }
  0x28   :  { %p947_p10 = scmp.ne.s32.totalorder %s610_s1, %s946_s9  ;;  %p952_p12 = scmp.lt.s32.totalorder %s946_s9, %s946_s9 }
  0x2a   :  { %212 = vmatpush1.bf16.msra.mxu0 %v882_v6  ;;  %857 = vmatpush1.bf16.msra.mxu1 %v882_v6  ;;  %p953_p13 = por %p952_p12, %p951_p11 }
  0x2b   :  { %213 = vmatprep.subr.bf16.mxu0 %v883_v7  ;;  %850 = vmatprep.subr.bf16.mxu1 %v883_v7 }
  0x2c   :  { %p954_p0 = pnand %p953_p13, %p947_p10 }
  0x2e   :  { %214 = vmatpush1.bf16.msra.mxu0 %v885_v8  ;;  %858 = vmatpush1.bf16.msra.mxu1 %v885_v8 }
  0x2f   :  { %215 = vmatprep.subr.bf16.mxu0 %v886_v9  ;;  %851 = vmatprep.subr.bf16.mxu1 %v886_v9 }
  0x32   :  { %216 = vmatpush1.bf16.msra.mxu0 %v888_v10  ;;  %859 = vmatpush1.bf16.msra.mxu1 %v888_v10 }
  0x33   :  { %217 = vmatprep.subr.bf16.mxu0 %v889_v11  ;;  %852 = vmatprep.subr.bf16.mxu1 %v889_v11 }
  0x36   :  { %218 = vmatpush1.bf16.msra.mxu0 %v891_v12  ;;  %860 = vmatpush1.bf16.msra.mxu1 %v891_v12 }
  0x37   :  { %219 = vmatprep.subr.bf16.mxu0 %v892_v13  ;;  %853 = vmatprep.subr.bf16.mxu1 %v892_v13 }
  0x3a   :  { %220 = vmatpush1.bf16.msra.mxu0 %v894_v14  ;;  %861 = vmatpush1.bf16.msra.mxu1 %v894_v14 }
  0x3b   :  { %221 = vmatprep.subr.bf16.mxu0 %v895_v15  ;;  %854 = vmatprep.subr.bf16.mxu1 %v895_v15 }
  0x3e   :  { %222 = vmatpush1.bf16.msra.mxu0 %v897_v16  ;;  %862 = vmatpush1.bf16.msra.mxu1 %v897_v16 }
  0x41   :  { %240 = vmatmul.mubr.bf16.vlgmr.msra.gmra.mxu0 %v898_v17  ;;  %280 = vmatmul.mubr.bf16.vlgmr.msra.gmra.mxu1 %v900_v18 }
  0x42   :  { %249 = vmatprep.mubr.bf16.mxu0 %v1042_v0  ;;  %289 = vmatprep.mubr.bf16.mxu1 %v1042_v0 }
  0x49   :  { %250 = vmatmul.mubr.bf16.gmra.mxu0 %v899_v19  ;;  %290 = vmatmul.mubr.bf16.gmra.mxu1 %v902_v20 }
  0x4a   :  { %259 = vmatprep.mubr.bf16.mxu0 %v1042_v0  ;;  %299 = vmatprep.mubr.bf16.mxu1 %v1042_v0 }
  0x51   :  { %260 = vmatmul.mubr.bf16.gmra.mxu0 %v901_v21  ;;  %300 = vmatmul.mubr.bf16.gmra.mxu1 %v904_v22 }
  0x52   :  { %269 = vmatprep.mubr.bf16.mxu0 %v1042_v0  ;;  %309 = vmatprep.mubr.bf16.mxu1 %v1042_v0 }
  0x59   :  { %270 = vmatmul.mubr.bf16.gmra.mxu0 %v903_v23  ;;  %310 = vmatmul.mubr.bf16.gmra.mxu1 %v905_v24 }
 0x101   :  { %v241_v25 = vpop.f32.mrf.mxu0  ;;  %v1094_v26 = vpop.f32.mrf.mxu1 }
 0x102   :  { %v501_v49 = vmul.f32 %v241_v25, %v241_v25 }
 0x103   :  { %v243_v27 = vpop.f32.mrf.mxu0  ;;  %v1096_v28 = vpop.f32.mrf.mxu1 }
 0x104   :  { %v564_v60 = vmul.f32 %v243_v27, %v243_v27 }
 0x105   :  { %v245_v29 = vpop.f32.mrf.mxu0  ;;  %v1098_v30 = vpop.f32.mrf.mxu1 }
 0x106   :  { %v756_v31 = vpack.c.bf16 %v245_v29, %v241_v25  ;;  %v776_v32 = vpack.c.bf16 %v1098_v30, %v1094_v26  ;;  %v502_v44 = vmul.f32 %v245_v29, %v245_v29  ;;  %v480_v54 = vadd.f32 %v245_v29, %v241_v25 }
 0x107   :  { %v247_v33 = vpop.f32.mrf.mxu0  ;;  %v1102_v34 = vpop.f32.mrf.mxu1 }
 0x108   :  { %757 = vst [vmem:[#allocation7] sm:$0xff] %v756_v31   ;;  %v796_v35 = vpack.c.bf16 %v247_v33, %v243_v27  ;;  %836 = vst [vmem:[#allocation7 + $0x20] sm:$0xff] %v776_v32   ;;  %v816_v37 = vpack.c.bf16 %v1102_v34, %v1096_v28  ;;  %v565_v55 = vmul.f32 %v247_v33, %v247_v33 }
 0x109   :  { %v251_v36 = vpop.f32.mrf.mxu0  ;;  %v1106_v38 = vpop.f32.mrf.mxu1  ;;  %v517_v56 = vadd.f32 %v502_v44, %v501_v49  ;;  %v543_v61 = vadd.f32 %v247_v33, %v243_v27 }
 0x10a   :  { %797 = vst [vmem:[#allocation8] sm:$0xff] %v796_v35   ;;  %843 = vst [vmem:[#allocation8 + $0x20] sm:$0xff] %v816_v37   ;;  %v503_v50 = vmul.f32 %v251_v36, %v251_v36  ;;  %v481_v62 = vadd.f32 %v480_v54, %v251_v36  ;;  %v580_v4 = vadd.f32 %v565_v55, %v564_v60 }
 0x10b   :  { %v253_v39 = vpop.f32.mrf.mxu0  ;;  %v1108_v40 = vpop.f32.mrf.mxu1 }
 0x10c   :  { %v518_v63 = vadd.f32 %v517_v56, %v503_v50  ;;  %v566_v0 = vmul.f32 %v253_v39, %v253_v39  ;;  %v544_v5 = vadd.f32 %v543_v61, %v253_v39  ;;  %v509_v50 = vmul.f32 %v1094_v26, %v1094_v26 }
 0x10d   :  { %v255_v41 = vpop.f32.mrf.mxu0  ;;  %v1110_v42 = vpop.f32.mrf.mxu1 }
 0x10e   :  { %v761_v43 = vpack.c.bf16 %v255_v41, %v251_v36  ;;  %v781_v46 = vpack.c.bf16 %v1110_v42, %v1106_v38  ;;  %v504_v57 = vmul.f32 %v255_v41, %v255_v41  ;;  %v482_v6 = vadd.f32 %v481_v62, %v255_v41 }
 0x10f   :  { %v257_v45 = vpop.f32.mrf.mxu0  ;;  %v1114_v47 = vpop.f32.mrf.mxu1  ;;  %v581_v17 = vadd.f32 %v580_v4, %v566_v0  ;;  %v510_v0 = vmul.f32 %v1098_v30, %v1098_v30 }
 0x110   :  { %833 = vst [vmem:[#allocation7 + $0x8] sm:$0xff] %v761_v43   ;;  %v801_v48 = vpack.c.bf16 %v257_v45, %v253_v39  ;;  %837 = vst [vmem:[#allocation7 + $0x28] sm:$0xff] %v781_v46   ;;  %v821_v52 = vpack.c.bf16 %v1114_v47, %v1108_v40  ;;  %v519_v8 = vadd.f32 %v518_v63, %v504_v57 }
 0x111   :  { %v261_v51 = vpop.f32.mrf.mxu0  ;;  %v1118_v53 = vpop.f32.mrf.mxu1  ;;  %v567_v9 = vmul.f32 %v257_v45, %v257_v45  ;;  %v545_v14 = vadd.f32 %v544_v5, %v257_v45 }
 0x112   :  { %840 = vst [vmem:[#allocation8 + $0x8] sm:$0xff] %v801_v48   ;;  %844 = vst [vmem:[#allocation8 + $0x28] sm:$0xff] %v821_v52   ;;  %v505_v1 = vmul.f32 %v261_v51, %v261_v51  ;;  %v483_v15 = vadd.f32 %v482_v6, %v261_v51 }
 0x113   :  { %v263_v58 = vpop.f32.mrf.mxu0  ;;  %v1120_v59 = vpop.f32.mrf.mxu1  ;;  %v582_v27 = vadd.f32 %v581_v17, %v567_v9 }
 0x114   :  { %v520_v18 = vadd.f32 %v519_v8, %v505_v1  ;;  %v568_v19 = vmul.f32 %v263_v58, %v263_v58  ;;  %v546_v23 = vadd.f32 %v545_v14, %v263_v58 }
 0x115   :  { %v265_v2 = vpop.f32.mrf.mxu0  ;;  %v1122_v3 = vpop.f32.mrf.mxu1 }
 0x116   :  { %v766_v7 = vpack.c.bf16 %v265_v2, %v261_v51  ;;  %v506_v10 = vmul.f32 %v265_v2, %v265_v2  ;;  %v786_v12 = vpack.c.bf16 %v1122_v3, %v1118_v53  ;;  %v484_v24 = vadd.f32 %v483_v15, %v265_v2 }
 0x117   :  { %v267_v11 = vpop.f32.mrf.mxu0  ;;  %v1126_v13 = vpop.f32.mrf.mxu1  ;;  %v583_v37 = vadd.f32 %v582_v27, %v568_v19 }
 0x118   :  { %834 = vst [vmem:[#allocation7 + $0x10] sm:$0xff] %v766_v7   ;;  %v806_v16 = vpack.c.bf16 %v267_v11, %v263_v58  ;;  %838 = vst [vmem:[#allocation7 + $0x30] sm:$0xff] %v786_v12   ;;  %v826_v21 = vpack.c.bf16 %v1126_v13, %v1120_v59  ;;  %v521_v29 = vadd.f32 %v520_v18, %v506_v10 }
 0x119   :  { %v271_v20 = vpop.f32.mrf.mxu0  ;;  %v1130_v22 = vpop.f32.mrf.mxu1  ;;  %v569_v31 = vmul.f32 %v267_v11, %v267_v11  ;;  %v547_v35 = vadd.f32 %v546_v23, %v267_v11 }
 0x11a   :  { %841 = vst [vmem:[#allocation8 + $0x10] sm:$0xff] %v806_v16   ;;  %v507_v25 = vmul.f32 %v271_v20, %v271_v20  ;;  %845 = vst [vmem:[#allocation8 + $0x30] sm:$0xff] %v826_v21   ;;  %v485_v36 = vadd.f32 %v484_v24, %v271_v20 }
 0x11b   :  { %v273_v32 = vpop.f32.mrf.mxu0  ;;  %v1132_v33 = vpop.f32.mrf.mxu1  ;;  %v584_v51 = vadd.f32 %v583_v37, %v569_v31 }
 0x11c   :  { %v522_v39 = vadd.f32 %v521_v29, %v507_v25  ;;  %v570_v41 = vmul.f32 %v273_v32, %v273_v32  ;;  %v548_v45 = vadd.f32 %v547_v35, %v273_v32 }
 0x11d   :  { %v275_v43 = vpop.f32.mrf.mxu0  ;;  %v1134_v44 = vpop.f32.mrf.mxu1 }
 0x11e   :  { %v771_v46 = vpack.c.bf16 %v275_v43, %v271_v20  ;;  %v486_v48 = vadd.f32 %v485_v36, %v275_v43  ;;  %v508_v49 = vmul.f32 %v275_v43, %v275_v43  ;;  %v791_v54 = vpack.c.bf16 %v1134_v44, %v1130_v22 }
 0x11f   :  { %v277_v52 = vpop.f32.mrf.mxu0  ;;  %v1140_v55 = vpop.f32.mrf.mxu1  ;;  %v585_v61 = vadd.f32 %v584_v51, %v570_v41 }
 0x120   :  { %835 = vst [vmem:[#allocation7 + $0x18] sm:$0xff] %v771_v46   ;;  %v487_v56 = vadd.f32 %v486_v48, %v1094_v26  ;;  %v523_v57 = vadd.f32 %v522_v39, %v508_v49  ;;  %v811_v58 = vpack.c.bf16 %v277_v52, %v273_v32  ;;  %v549_v60 = vadd.f32 %v548_v45, %v277_v52 }
 0x121   :  { %v571_v62 = vmul.f32 %v277_v52, %v277_v52  ;;  %839 = vst [vmem:[#allocation7 + $0x38] sm:$0xff] %v791_v54   ;;  %v831_v63 = vpack.c.bf16 %v1140_v55, %v1132_v33 }
 0x122   :  { %v488_v1 = vadd.f32 %v487_v56, %v1098_v30  ;;  %v524_v2 = vadd.f32 %v523_v57, %v509_v50  ;;  %842 = vst [vmem:[#allocation8 + $0x18] sm:$0xff] %v811_v58   ;;  %v550_v26 = vadd.f32 %v549_v60, %v1096_v28 }
 0x123   :  { %957 = shalt.err (!%p954_p0)
}
 0x124   :  { %615 = dma.vmem_to_hbm [thread:$0]  %s610_s1, 1024, %s1221_s2, [#allocation4], %s1037_s21, %s1037_s21, %s1038_s22   ;;  %v572_v30 = vmul.f32 %v1096_v28, %v1096_v28  ;;  %v586_v4 = vadd.f32 %v585_v61, %v571_v62  ;;  %846 = vst [vmem:[#allocation8 + $0x38] sm:$0xff] %v831_v63   ;;  %v511_v5 = vmul.f32 %v1106_v38, %v1106_v38  ;;  %v525_v6 = vadd.f32 %v524_v2, %v510_v0 }
 0x125   :  { %v551_v7 = vadd.f32 %v550_v26, %v1102_v34  ;;  %v489_v8 = vadd.f32 %v488_v1, %v1106_v38  ;;  %s966_s12 = scalar_lea.vmem %s1145_s8, 1024  ;;  %p971_p2 = scmp.lt.s32.totalorder %s1145_s8, %s1145_s8 }
 0x126   :  { %p967_p1 = scmp.ne.s32.totalorder %s1145_s8, %s966_s12  ;;  %p972_p3 = scmp.lt.s32.totalorder %s966_s12, %s966_s12 }
 0x128   :  { %p973_p4 = por %p972_p3, %p971_p2 }
 0x12a   :  { %p974_p5 = pnand %p973_p4, %p967_p1 }
 0x12c   :  { %977 = shalt.err (!%p974_p5)
}
 0x12d   :  { %627 = dma.vmem_to_hbm [thread:$0]  %s1145_s8, 1024, %s1222_s3, [#allocation9], %s1037_s21, %s1037_s21, %s1038_s22   ;;  %v573_v28 = vmul.f32 %v1102_v34, %v1102_v34  ;;  %v587_v38 = vadd.f32 %v586_v4, %v572_v30  ;;  %v512_v9 = vmul.f32 %v1110_v42, %v1110_v42  ;;  %v552_v10 = vadd.f32 %v551_v7, %v1108_v40 }
 0x12e   :  { %v490_v11 = vadd.f32 %v489_v8, %v1110_v42  ;;  %v526_v12 = vadd.f32 %v525_v6, %v511_v5  ;;  %v574_v14 = vmul.f32 %v1108_v40, %v1108_v40  ;;  %v513_v16 = vmul.f32 %v1118_v53, %v1118_v53  ;;  %s1045_s3 = smov [#allocation10]   ;;  %s1046_s15 = smov [#allocation11]  }
 0x12f   :  { %v588_v15 = vadd.f32 %v587_v38, %v573_v28  ;;  %v553_v34 = vadd.f32 %v552_v10, %v1114_v47  ;;  %v575_v19 = vmul.f32 %v1114_v47, %v1114_v47  ;;  %v514_v42 = vmul.f32 %v1122_v3, %v1122_v3  ;;  %s634_s14 = sshll.u32 %s1045_s3, 4  ;;  %s644_s16 = sshll.u32 %s1046_s15, 4  ;;  %s635_s14 = int_to_ptr.vmem [resolvable:$true] %s634_s14  ;;  %s645_s16 = int_to_ptr.vmem [resolvable:$true] %s644_s16 }
 0x130   :  { %v491_v17 = vadd.f32 %v490_v11, %v1118_v53  ;;  %v527_v18 = vadd.f32 %v526_v12, %v512_v9  ;;  %v576_v24 = vmul.f32 %v1120_v59, %v1120_v59  ;;  %v515_v47 = vmul.f32 %v1130_v22, %v1130_v22  ;;  %s986_s17 = scalar_lea.vmem %s635_s14, 128  ;;  %p991_p7 = scmp.lt.s32.totalorder %s635_s14, %s635_s14 }
 0x131   :  { %v589_v20 = vadd.f32 %v588_v15, %v574_v14  ;;  %v554_v40 = vadd.f32 %v553_v34, %v1120_v59  ;;  %v577_v31 = vmul.f32 %v1126_v13, %v1126_v13  ;;  %v516_v59 = vmul.f32 %v1134_v44, %v1134_v44  ;;  %p987_p6 = scmp.ne.s32.totalorder %s635_s14, %s986_s17  ;;  %p992_p8 = scmp.lt.s32.totalorder %s986_s17, %s986_s17 }
 0x132   :  { %v492_v21 = vadd.f32 %v491_v17, %v1122_v3  ;;  %v528_v23 = vadd.f32 %v527_v18, %v513_v16  ;;  %v578_v39 = vmul.f32 %v1132_v33, %v1132_v33  ;;  %vm538_vm0 = vcmask 1040384  }
 0x133   :  { %v590_v25 = vadd.f32 %v589_v20, %v575_v19  ;;  %v555_v27 = vadd.f32 %v554_v40, %v1126_v13  ;;  %v579_v13 = vmul.f32 %v1140_v55, %v1140_v55  ;;  %vm540_vm1 = vcmask 1041408   ;;  %p993_p9 = por %p992_p8, %p991_p7 }
 0x134   :  { %v529_v53 = vadd.f32 %v528_v23, %v514_v42  ;;  %v493_v29 = vadd.f32 %v492_v21, %v1130_v22 }
 0x135   :  { %v591_v32 = vadd.f32 %v590_v25, %v576_v24  ;;  %v556_v35 = vadd.f32 %v555_v27, %v1132_v33  ;;  %p994_p10 = pnand %p993_p9, %p987_p6 }
 0x136   :  { %v530_v3 = vadd.f32 %v529_v53, %v515_v47  ;;  %v494_v36 = vadd.f32 %v493_v29, %v1134_v44 }
 0x137   :  { %v592_v37 = vadd.f32 %v591_v32, %v577_v31  ;;  %v557_v22 = vadd.f32 %v556_v35, %v1140_v55 }
 0x138   :  { %v495_v41 = vrot.slane %v494_v36, 4  ;;  %v531_v43 = vadd.f32 %v530_v3, %v516_v59 }
 0x139   :  { %v593_v45 = vadd.f32 %v592_v37, %v578_v39  ;;  %v558_v49 = vrot.slane %v557_v22, 4 }
 0x13a   :  { %v496_v46 = vadd.f32 %v495_v41, %v494_v36  ;;  %v532_v48 = vrot.slane %v531_v43, 4 }
 0x13b   :  { %v594_v50 = vadd.f32 %v593_v45, %v579_v13  ;;  %v559_v54 = vadd.f32 %v558_v49, %v557_v22 }
 0x13c   :  { %v497_v51 = vrot.slane %v496_v46, 2  ;;  %v533_v52 = vadd.f32 %v532_v48, %v531_v43 }
 0x13d   :  { %v595_v44 = vrot.slane %v594_v50, 4  ;;  %v560_v58 = vrot.slane %v559_v54, 2 }
 0x13e   :  { %v498_v56 = vadd.f32 %v497_v51, %v496_v46  ;;  %v534_v57 = vrot.slane %v533_v52, 2 }
 0x13f   :  { %v596_v33 = vadd.f32 %v595_v44, %v594_v50  ;;  %v561_v62 = vadd.f32 %v560_v58, %v559_v54 }
 0x140   :  { %v499_v60 = vrot.slane %v498_v56, 1  ;;  %v535_v61 = vadd.f32 %v534_v57, %v533_v52 }
 0x141   :  { %v597_v63 = vrot.slane %v596_v33, 2  ;;  %v562_v1 = vrot.slane %v561_v62, 1 }
 0x142   :  { %v536_v0 = vrot.slane %v535_v61, 1  ;;  %v500_v55 = vadd.f32 %v499_v60, %v498_v56 }
 0x143   :  { %v598_v2 = vadd.f32 %v597_v63, %v596_v33  ;;  %v563_v5 = vadd.f32 %v562_v1, %v561_v62 }
 0x144   :  { %v537_v26 = vadd.f32 %v536_v0, %v535_v61 }
 0x145   :  { %v599_v30 = vrot.slane %v598_v2, 1 }
 0x146   :  { %v539_v4 = vsel %vm538_vm0, %v500_v55, %v537_v26 }
 0x147   :  { %v541_v6 = vsel %vm540_vm1, %v539_v4, 0.0  ;;  %v600_v7 = vadd.f32 %v599_v30, %v598_v2 }
 0x148   :  { %542 = vst [vmem:[#allocation10] sm:$0xff] %v541_v6 }
 0x149   :  { %997 = shalt.err (!%p994_p10)
}
 0x14a   :  { %637 = dma.vmem_to_hbm [thread:$0]  %s635_s14, 128, %s1223_s4, [#allocation9]   ;;  %v601_v8 = vsel %vm538_vm0, %v563_v5, %v600_v7 }
 0x14b   :  { %v602_v28 = vsel %vm540_vm1, %v601_v8, 0.0  ;;  %s1006_s20 = scalar_lea.vmem %s645_s16, 128  ;;  %p1011_p12 = scmp.lt.s32.totalorder %s645_s16, %s645_s16 }
 0x14c   :  { %603 = vst [vmem:[#allocation11] sm:$0xff] %v602_v28  ;;  %p1007_p11 = scmp.ne.s32.totalorder %s645_s16, %s1006_s20  ;;  %p1012_p13 = scmp.lt.s32.totalorder %s1006_s20, %s1006_s20 }
 0x14e   :  { %p1013_p0 = por %p1012_p13, %p1011_p12 }
 0x150   :  { %p1014_p1 = pnand %p1013_p0, %p1007_p11 }
 0x152   :  { %1017 = shalt.err (!%p1014_p1)
}
 0x153   :  { %647 = dma.vmem_to_hbm [thread:$0]  %s645_s16, 128, %s1224_s5, [#allocation12]  }
 0x154   :  { %1030 = dma.done.wait [#allocation4], 1024  }
 0x155   :  { %1031 = vsyncadd [#allocation4], 4294966272 }
 0x156   :  { %1032 = dma.done.wait [#allocation9], 1152  }
 0x157   :  { %1033 = vsyncadd [#allocation9], 4294966144 }
 0x158   :  { %1034 = dma.done.wait [#allocation12], 128  }
 0x159   :  { %1035 = vsyncadd [#allocation12], 4294967168 }
 0x15a   :  { %660 = vsyncpa [#allocation3], 1 }
 0x15b   :  { %661 = vsyncpa [#allocation6], 1 }
 0x15c   :  { %662 = vsyncpa [#allocation4], 1 }
 0x15d   :  { %663 = vsyncpa [#allocation9], 1 }
 0x15e   :  { %664 = vsyncpa [#allocation12], 1 }

</bundles_post_ra>
